<compile_context>
chip_gen: v7x
topology: tpu7x:2x2x1
jax: 0.10.0
libtpu: 0.0.40
codegen_flags: <defaults>
</compile_context>

<pallas_src>
import functools

import jax
import jax.numpy as jnp
from jax.experimental import pallas as pl
from jax.experimental.pallas import tpu as pltpu

SMILE_CLIP = 5.0


# -----------------------------------------------------------------------------
# Kernel
# -----------------------------------------------------------------------------
def decoupled_smile_kernel(
    v0_ref,        # [N, V_dim]   f32
    v1_ref,        # [N, V_dim]   f32
    p_ref,         # [P_rows, 128] f32 packed parameter slab
    scores_ref,    # out [N, N]   f32 (VMEM)
    mi_ref,        # out [1, 1]   f32 (SMEM)
    vstack_ref,    # scratch [2N, V_dim] f32 (VMEM)
    *,
    V_dim,
    C,
):
    n = scores_ref.shape[0]

    # Stack V0 / V1 in VMEM so the shared encoder trunk runs once over 2N rows
    # (both halves are sublane-tile aligned at n = 8).
    vstack_ref[:n, :] = v0_ref[...]
    vstack_ref[n:, :] = v1_ref[...]
    v = vstack_ref[...]

    # Static row/lane slices into the packed parameter slab.
    r = 0
    w1 = p_ref[r:r + V_dim, :]              # (V_dim, 128)
    r += V_dim
    b1 = p_ref[r:r + 1, :]                  # (1, 128)
    r += 1
    w2 = p_ref[r:r + 128, 0:64]             # (128, 64)
    r += 128
    b2 = p_ref[r:r + 1, 0:64]               # (1, 64)
    r += 1
    w3 = p_ref[r:r + 64, 0:2 * C]           # (64, 2C): [w3 | w3 @ W]
    r += 64
    b3 = p_ref[r:r + 1, 0:2 * C]            # (1, 2C):  [b3 | b3 @ W]

    # Shared encoder trunk (layers 1-2) over the stacked batch.
    h = jnp.dot(v, w1, preferred_element_type=jnp.float32) + b1
    h = jnp.maximum(h, 0.0)
    h = jnp.dot(h, w2, preferred_element_type=jnp.float32) + b2
    h = jnp.maximum(h, 0.0)

    # Single merged layer-3 matmul for both branches: [2N, 2C].
    out3 = jnp.dot(h, w3, preferred_element_type=jnp.float32) + b3
    v0_enc = out3[:n, 0:C]                  # v_encoder(V0)
    v1_w = out3[n:, C:2 * C]                # W @ v_encoder(V1)  (W folded in)

    # scores[i, j] = <v0_enc[i], v1_w[j]>  -- contract last dims, no transpose.
    scores = jax.lax.dot_general(
        v0_enc, v1_w,
        dimension_numbers=(((1,), (1,)), ((), ())),
        preferred_element_type=jnp.float32,
    )
    scores_ref[...] = scores

    # ---- SMILE MI estimate ----
    # Joint (diagonal) term via a rowwise elementwise reduction (no NxN mask
    # needed for the unclipped first term).
    diag = jnp.sum(v0_enc * v1_w, axis=-1, keepdims=True)           # [N, 1]
    diag_mean = jnp.sum(diag) / jnp.float32(n)

    # Off-diagonal log-mean-exp of clipped scores.  Mask the diagonal BEFORE
    # the exp-sum (avoids catastrophic cancellation of exp sums); shift by the
    # static clip bound so every exponent is <= 0.
    clipped = jnp.clip(scores, -SMILE_CLIP, SMILE_CLIP)
    rows = jax.lax.broadcasted_iota(jnp.int32, (n, n), 0)
    cols = jax.lax.broadcasted_iota(jnp.int32, (n, n), 1)
    exp_off = jnp.where(rows != cols, jnp.exp(clipped - SMILE_CLIP), 0.0)
    lse_off = jnp.log(jnp.sum(exp_off)) + SMILE_CLIP
    log_mean_exp_nodiag = lse_off - jnp.log(jnp.float32(n * (n - 1)))

    mi_ref[0, 0] = diag_mean - log_mean_exp_nodiag


# -----------------------------------------------------------------------------
# Host-side helpers
# -----------------------------------------------------------------------------
def pack_params(params):
    """One-time parameter packing (outside the get_MI hot path).

    Folds the bias-free `W` Linear into the V1 branch's third layer and packs
    every weight/bias into a single lane-dense [P_rows, 128] f32 slab:
        rows [0, V_dim)           : w1   (V_dim, 128)
        row  V_dim                : b1   (1, 128)
        rows [V_dim+1, V_dim+129) : w2   (128, 64)  lane-padded to 128
        row  V_dim+129            : b2   (1, 64)    lane-padded
        rows [V_dim+130, +194)    : [w3 | w3@W] (64, 2C) lane-padded
        row  V_dim+194            : [b3 | b3@W] (1, 2C)  lane-padded
    """
    w3w = jnp.dot(params["w3"], params["W"])
    b3w = jnp.dot(params["b3"], params["W"])
    w3cat = jnp.concatenate([params["w3"], w3w], axis=1)     # (64, 2C)
    b3cat = jnp.concatenate([params["b3"], b3w], axis=1)     # (1, 2C)

    def pad_lanes(x):
        return jnp.pad(x, ((0, 0), (0, 128 - x.shape[1])))

    slab = jnp.concatenate(
        [
            params["w1"].astype(jnp.float32),
            params["b1"].astype(jnp.float32),
            pad_lanes(params["w2"].astype(jnp.float32)),
            pad_lanes(params["b2"].astype(jnp.float32)),
            pad_lanes(w3cat.astype(jnp.float32)),
            pad_lanes(b3cat.astype(jnp.float32)),
        ],
        axis=0,
    )
    return slab


def decoupled_smile_get_mi(V0, V1, packed_params, critic_output_dim):
    """Returns (scores [N,N], mi [1,1]) computed in one fused Pallas kernel."""
    N, V_dim = V0.shape
    C = critic_output_dim
    P_rows = packed_params.shape[0]

    vmem = pl.BlockSpec(memory_space=pltpu.MemorySpace.VMEM)
    smem = pl.BlockSpec(memory_space=pltpu.MemorySpace.SMEM)

    out_shapes = (
        jax.ShapeDtypeStruct((N, N), jnp.float32),
        jax.ShapeDtypeStruct((1, 1), jnp.float32),
    )

    flops = 2 * (2 * N * V_dim * 128 + 2 * N * 128 * 64
                 + 2 * N * 64 * 2 * C + N * N * C)
    cost = pl.CostEstimate(
        flops=flops,
        transcendentals=N * N + 4,
        bytes_accessed=4 * (2 * N * V_dim + P_rows * 128 + N * N + 1),
    )

    kernel = functools.partial(decoupled_smile_kernel, V_dim=V_dim, C=C)
    return pl.pallas_call(
        kernel,
        out_shape=out_shapes,
        in_specs=[vmem, vmem, vmem],
        out_specs=(vmem, smem),
        scratch_shapes=[pltpu.VMEM((2 * N, V_dim), jnp.float32)],
        cost_estimate=cost,
        compiler_params=pltpu.CompilerParams(),
    )(V0.astype(jnp.float32), V1.astype(jnp.float32), packed_params)


def init_params(key, V_dim, critic_output_dim):
    """Deterministic synthetic parameters; shapes mirror the nn.Module.
    All Linear weights are stored transposed (in, out) for the kernel."""
    ks = jax.random.split(key, 7)

    def uniform(k, shape, fan_in):
        bound = 1.0 / jnp.sqrt(jnp.float32(fan_in))
        return jax.random.uniform(k, shape, jnp.float32, -bound, bound)

    C = critic_output_dim
    return {
        "w1": uniform(ks[0], (V_dim, 128), V_dim),
        "b1": uniform(ks[1], (1, 128), V_dim),
        "w2": uniform(ks[2], (128, 64), 128),
        "b2": uniform(ks[3], (1, 64), 128),
        "w3": uniform(ks[4], (64, C), 64),
        "b3": uniform(ks[5], (1, C), 64),
        "W":  uniform(ks[6], (C, C), C),   # (in, out) == torch W.weight^T
    }


if __name__ == "__main__":
    N = 8            # batch of samples (must be >= 2 for SMILE)
    V_dim = 32       # input feature dim
    C = 16           # critic_output_dim

    key = jax.random.PRNGKey(0)
    k0, k1, kp = jax.random.split(key, 3)
    V0 = jax.random.normal(k0, (N, V_dim), jnp.float32)
    V1 = jax.random.normal(k1, (N, V_dim), jnp.float32)
    params = init_params(kp, V_dim, C)

    packed = jax.block_until_ready(pack_params(params))   # one-time, off hot path

    scores, mi = decoupled_smile_get_mi(V0, V1, packed, C)
    jax.block_until_ready((scores, mi))

    # ---- lightweight pure-JAX reference check ----
    def ref_encode(x):
        h = jnp.maximum(x @ params["w1"] + params["b1"], 0.0)
        h = jnp.maximum(h @ params["w2"] + params["b2"], 0.0)
        return h @ params["w3"] + params["b3"]

    ref_scores = ref_encode(V0) @ (ref_encode(V1) @ params["W"]).T
    assert jnp.allclose(scores, ref_scores, atol=1e-4, rtol=1e-4)

    diag_mean_ref = jnp.mean(jnp.diag(ref_scores))
    clipped_ref = jnp.clip(ref_scores, -SMILE_CLIP, SMILE_CLIP)
    off_ref = jnp.where(~jnp.eye(N, dtype=bool), clipped_ref, -jnp.inf)
    m_ref = jnp.max(off_ref)
    lse_ref = jnp.log(jnp.sum(jnp.exp(off_ref - m_ref))) + m_ref
    mi_ref_val = diag_mean_ref - (lse_ref - jnp.log(jnp.float32(N * (N - 1))))
    assert jnp.allclose(mi[0, 0], mi_ref_val, atol=1e-4, rtol=1e-4)

    print("KERNEL_OK")
</pallas_src>

<mosaic_0001>
module attributes {stable_mosaic.version = 11 : i64} {
  func.func @decoupled_smile_kernel(%arg0: memref<8x32xf32, #tpu.memory_space<vmem>>, %arg1: memref<8x32xf32, #tpu.memory_space<vmem>>, %arg2: memref<227x128xf32, #tpu.memory_space<vmem>>, %arg3: memref<8x8xf32, #tpu.memory_space<vmem>>, %arg4: memref<1x1xf32, #tpu.memory_space<smem>>, %arg5: memref<16x32xf32, #tpu.memory_space<vmem>>) attributes {dimension_semantics = [], scalar_prefetch = 0 : i64, scratch_operands = 1 : i64, tpu.core_type = #tpu.core_type<tc>} {
    %c0 = arith.constant 0 : index
    %c0_0 = arith.constant 0 : index
    %0 = vector.load %arg0[%c0, %c0_0] : memref<8x32xf32, #tpu.memory_space<vmem>>, vector<8x32xf32>
    %c0_1 = arith.constant 0 : index
    %c0_2 = arith.constant 0 : index
    %1 = vector.load %arg5[%c0_1, %c0_2] : memref<16x32xf32, #tpu.memory_space<vmem>>, vector<8x32xf32>
    tpu.vector_store %arg5[%c0_1, %c0_2], %0 {strides = array<i32>} : memref<16x32xf32, #tpu.memory_space<vmem>>, vector<8x32xf32>,
    %c0_3 = arith.constant 0 : index
    %c0_4 = arith.constant 0 : index
    %2 = vector.load %arg1[%c0_3, %c0_4] : memref<8x32xf32, #tpu.memory_space<vmem>>, vector<8x32xf32>
    %c8 = arith.constant 8 : index
    %c0_5 = arith.constant 0 : index
    %3 = vector.load %arg5[%c8, %c0_5] : memref<16x32xf32, #tpu.memory_space<vmem>>, vector<8x32xf32>
    tpu.vector_store %arg5[%c8, %c0_5], %2 {strides = array<i32>} : memref<16x32xf32, #tpu.memory_space<vmem>>, vector<8x32xf32>,
    %c0_6 = arith.constant 0 : index
    %c0_7 = arith.constant 0 : index
    %4 = vector.load %arg5[%c0_6, %c0_7] : memref<16x32xf32, #tpu.memory_space<vmem>>, vector<16x32xf32>
    %c0_8 = arith.constant 0 : index
    %c0_9 = arith.constant 0 : index
    %5 = vector.load %arg2[%c0_8, %c0_9] : memref<227x128xf32, #tpu.memory_space<vmem>>, vector<32x128xf32>
    %c32 = arith.constant 32 : index
    %c0_10 = arith.constant 0 : index
    %6 = vector.load %arg2[%c32, %c0_10] : memref<227x128xf32, #tpu.memory_space<vmem>>, vector<1x128xf32>
    %c33 = arith.constant 33 : index
    %c0_11 = arith.constant 0 : index
    %7 = vector.load %arg2[%c33, %c0_11] : memref<227x128xf32, #tpu.memory_space<vmem>>, vector<128x64xf32>
    %c161 = arith.constant 161 : index
    %c0_12 = arith.constant 0 : index
    %8 = vector.load %arg2[%c161, %c0_12] : memref<227x128xf32, #tpu.memory_space<vmem>>, vector<1x64xf32>
    %c162 = arith.constant 162 : index
    %c0_13 = arith.constant 0 : index
    %9 = vector.load %arg2[%c162, %c0_13] : memref<227x128xf32, #tpu.memory_space<vmem>>, vector<64x32xf32>
    %c226 = arith.constant 226 : index
    %c0_14 = arith.constant 0 : index
    %10 = vector.load %arg2[%c226, %c0_14] : memref<227x128xf32, #tpu.memory_space<vmem>>, vector<1x32xf32>
    %cst = arith.constant dense<0.000000e+00> : vector<16x128xf32>
    %11 = tpu.matmul %4, %5, %cst {dimension_numbers = #tpu.dot_dimension_numbers<[1], [0], [0], [1], [0, 0, 1, 1], [], []>} : vector<16x32xf32>, vector<32x128xf32>, vector<16x128xf32> -> vector<16x128xf32>
    %12 = vector.broadcast %6 : vector<1x128xf32> to vector<16x128xf32>
    %13 = arith.addf %11, %12 : vector<16x128xf32>
    %cst_15 = arith.constant 0.000000e+00 : f32
    %14 = vector.broadcast %cst_15 : f32 to vector<16x128xf32>
    %15 = arith.maximumf %13, %14 : vector<16x128xf32>
    %cst_16 = arith.constant dense<0.000000e+00> : vector<16x64xf32>
    %16 = tpu.matmul %15, %7, %cst_16 {dimension_numbers = #tpu.dot_dimension_numbers<[1], [0], [0], [1], [0, 0, 1, 1], [], []>} : vector<16x128xf32>, vector<128x64xf32>, vector<16x64xf32> -> vector<16x64xf32>
    %17 = vector.broadcast %8 : vector<1x64xf32> to vector<16x64xf32>
    %18 = arith.addf %16, %17 : vector<16x64xf32>
    %cst_17 = arith.constant 0.000000e+00 : f32
    %19 = vector.broadcast %cst_17 : f32 to vector<16x64xf32>
    %20 = arith.maximumf %18, %19 : vector<16x64xf32>
    %cst_18 = arith.constant dense<0.000000e+00> : vector<16x32xf32>
    %21 = tpu.matmul %20, %9, %cst_18 {dimension_numbers = #tpu.dot_dimension_numbers<[1], [0], [0], [1], [0, 0, 1, 1], [], []>} : vector<16x64xf32>, vector<64x32xf32>, vector<16x32xf32> -> vector<16x32xf32>
    %22 = vector.broadcast %10 : vector<1x32xf32> to vector<16x32xf32>
    %23 = arith.addf %21, %22 : vector<16x32xf32>
    %24 = vector.extract_strided_slice %23 {offsets = [0, 0], sizes = [8, 16], strides = [1, 1]} : vector<16x32xf32> to vector<8x16xf32>
    %25 = vector.extract_strided_slice %23 {offsets = [8, 16], sizes = [8, 16], strides = [1, 1]} : vector<16x32xf32> to vector<8x16xf32>
    %cst_19 = arith.constant dense<0.000000e+00> : vector<8x8xf32>
    %26 = tpu.matmul %24, %25, %cst_19 {dimension_numbers = #tpu.dot_dimension_numbers<[1], [1], [0], [0], [0, 0, 1, 0], [], []>} : vector<8x16xf32>, vector<8x16xf32>, vector<8x8xf32> -> vector<8x8xf32>
    %c0_20 = arith.constant 0 : index
    %c0_21 = arith.constant 0 : index
    %27 = vector.load %arg3[%c0_20, %c0_21] : memref<8x8xf32, #tpu.memory_space<vmem>>, vector<8x8xf32>
    tpu.vector_store %arg3[%c0_20, %c0_21], %26 {strides = array<i32>} : memref<8x8xf32, #tpu.memory_space<vmem>>, vector<8x8xf32>,
    %28 = arith.mulf %24, %25 : vector<8x16xf32>
    %cst_22 = arith.constant dense<0.000000e+00> : vector<8xf32>
    %29 = vector.multi_reduction <add>, %28, %cst_22 [1] : vector<8x16xf32> to vector<8xf32>
    %30 = vector.shape_cast %29 : vector<8xf32> to vector<8x1xf32>
    %31 = vector.shape_cast %30 : vector<8x1xf32> to vector<1x8x1xf32>
    %cst_23 = arith.constant dense<0.000000e+00> : vector<1xf32>
    %32 = vector.multi_reduction <add>, %31, %cst_23 [1, 2] : vector<1x8x1xf32> to vector<1xf32>
    %33 = vector.shape_cast %32 : vector<1xf32> to vector<1x1x1xf32>
    %34 = vector.extract %33[0, 0, 0] : f32 from vector<1x1x1xf32>
    %cst_24 = arith.constant 8.000000e+00 : f32
    %35 = arith.divf %34, %cst_24 : f32
    %cst_25 = arith.constant -5.000000e+00 : f32
    %cst_26 = arith.constant 5.000000e+00 : f32
    %36 = vector.broadcast %cst_25 : f32 to vector<8x8xf32>
    %37 = arith.maximumf %36, %26 : vector<8x8xf32>
    %38 = vector.broadcast %cst_26 : f32 to vector<8x8xf32>
    %39 = arith.minimumf %38, %37 : vector<8x8xf32>
    %40 = tpu.iota {dimensions = array<i32: 0>} : vector<8x8xi32>
    %41 = tpu.iota {dimensions = array<i32: 1>} : vector<8x8xi32>
    %42 = arith.cmpi ne, %40, %41 : vector<8x8xi32>
    %cst_27 = arith.constant 5.000000e+00 : f32
    %43 = vector.broadcast %cst_27 : f32 to vector<8x8xf32>
    %44 = arith.subf %39, %43 : vector<8x8xf32>
    %45 = math.exp %44 : vector<8x8xf32>
    %cst_28 = arith.constant 0.000000e+00 : f32
    %46 = vector.broadcast %cst_28 : f32 to vector<8x8xf32>
    %47 = arith.select %42, %45, %46 : vector<8x8xi1>, vector<8x8xf32>
    %48 = vector.shape_cast %47 : vector<8x8xf32> to vector<1x8x8xf32>
    %cst_29 = arith.constant dense<0.000000e+00> : vector<1xf32>
    %49 = vector.multi_reduction <add>, %48, %cst_29 [1, 2] : vector<1x8x8xf32> to vector<1xf32>
    %50 = vector.shape_cast %49 : vector<1xf32> to vector<1x1x1xf32>
    %51 = vector.extract %50[0, 0, 0] : f32 from vector<1x1x1xf32>
    %52 = math.log %51 : f32
    %cst_30 = arith.constant 5.000000e+00 : f32
    %53 = arith.addf %52, %cst_30 : f32
    %cst_31 = arith.constant 5.600000e+01 : f32
    %54 = math.log %cst_31 : f32
    %55 = arith.subf %53, %54 : f32
    %56 = arith.subf %35, %55 : f32
    %c0_32 = arith.constant 0 : index
    %c0_33 = arith.constant 0 : index
    %57 = memref.load %arg4[%c0_32, %c0_33] : memref<1x1xf32, #tpu.memory_space<smem>>
    memref.store %56, %arg4[%c0_32, %c0_33] : memref<1x1xf32, #tpu.memory_space<smem>>
    return
  }
}

</mosaic_0001>

<bundles_post_ra>
// kernel: tpu_custom_call.1
= control target key start
LH: loop header
LB: loop body
LE: loop exit
PB: predicated region body
PF: predicated region fallthrough
CT: control target
= control target key end

     0   :  { %10 = vsyncpa [#allocation4], 0  ;;  %s905_s0 = inlined_call_operand.hbm [shape: f32[8,32], index: 0, kind: input, shape index: {}]   ;;  %s906_s1 = inlined_call_operand.hbm [shape: f32[8,32], index: 1, kind: input, shape index: {}]   ;;  %s907_s2 = inlined_call_operand.hbm [shape: f32[227,128], index: 2, kind: input, shape index: {}]   ;;  %s908_s3 = inlined_call_operand.hbm [shape: f32[8,8], index: 3, kind: output, shape index: {0}]   ;;  %s909_s4 = inlined_call_operand.hbm [shape: f32[1,1], index: 4, kind: output, shape index: {1}]  }
   0x1   :  { %11 = vsyncpa [#allocation8], 0 }
   0x2   :  { %12 = vsyncpa [#allocation5], 0 }
   0x3   :  { %13 = vsyncpa [#allocation6], 0  ;;  %s806_s15 = smov [#allocation7]   ;;  %s807_s17 = smov [#allocation3]  }
   0x4   :  { %s30_s16 = sshll.u32 %s806_s15, 4  ;;  %s20_s18 = sshll.u32 %s807_s17, 4  ;;  %s31_s16 = int_to_ptr.vmem [resolvable:$true] %s30_s16  ;;  %s21_s18 = int_to_ptr.vmem [resolvable:$true] %s20_s18 }
   0x5   :  { %s700_s21 = scalar_lea.hbm %s906_s1, 128 }
   0x6   :  { %p701_p0 = scmp.ne.s32.totalorder %s906_s1, %s700_s21  ;;  %p704_p1 = scmp.lt.u32.totalorder %s700_s21, %s906_s1 }
   0x8   :  { %p706_p2 = pnand %p704_p1, %p701_p0 }
   0xa   :  { %709 = shalt.err (!%p706_p2)
}
   0xb   :  { %s710_s26 = scalar_lea.vmem %s31_s16, 128  ;;  %p715_p4 = scmp.lt.s32.totalorder %s31_s16, %s31_s16 }
   0xc   :  { %p711_p3 = scmp.ne.s32.totalorder %s31_s16, %s710_s26  ;;  %p716_p5 = scmp.lt.s32.totalorder %s710_s26, %s710_s26 }
   0xe   :  { %p717_p6 = por %p716_p5, %p715_p4 }
  0x10   :  { %p718_p7 = pnand %p717_p6, %p711_p3 }
  0x12   :  { %721 = shalt.err (!%p718_p7)
}
  0x13   :  { %33 = dma.hbm_to_vmem [thread:$0]  %s906_s1, 128, %s31_s16, [#allocation8]  }
  0x14   :  { %s722_s5 = scalar_lea.hbm %s905_s0, 128 }
  0x15   :  { %p723_p8 = scmp.ne.s32.totalorder %s905_s0, %s722_s5  ;;  %p726_p9 = scmp.lt.u32.totalorder %s722_s5, %s905_s0 }
  0x17   :  { %p728_p10 = pnand %p726_p9, %p723_p8 }
  0x19   :  { %731 = shalt.err (!%p728_p10)
}
  0x1a   :  { %s732_s10 = scalar_lea.vmem %s21_s18, 128  ;;  %p737_p12 = scmp.lt.s32.totalorder %s21_s18, %s21_s18 }
  0x1b   :  { %p733_p11 = scmp.ne.s32.totalorder %s21_s18, %s732_s10  ;;  %p738_p13 = scmp.lt.s32.totalorder %s732_s10, %s732_s10 }
  0x1d   :  { %p739_p0 = por %p738_p13, %p737_p12 }
  0x1f   :  { %p740_p1 = pnand %p739_p0, %p733_p11 }
  0x21   :  { %743 = shalt.err (!%p740_p1)
}
  0x22   :  { %23 = dma.hbm_to_vmem [thread:$0]  %s905_s0, 128, %s21_s18, [#allocation4]  }
  0x23   :  { %s808_s12 = smov [#allocation9]   ;;  %s744_s16 = scalar_lea.hbm %s907_s2, 3712 }
  0x24   :  { %s39_s13 = sshll.u32 %s808_s12, 4  ;;  %p745_p2 = scmp.ne.s32.totalorder %s907_s2, %s744_s16  ;;  %s40_s13 = int_to_ptr.vmem [resolvable:$true] %s39_s13 }
  0x25   :  { %p748_p3 = scmp.lt.u32.totalorder %s744_s16, %s907_s2 }
  0x27   :  { %p750_p4 = pnand %p748_p3, %p745_p2 }
  0x29   :  { %753 = shalt.err (!%p750_p4)
}
  0x2a   :  { %s754_s22 = scalar_lea.vmem %s40_s13, 3712  ;;  %p759_p6 = scmp.lt.s32.totalorder %s40_s13, %s40_s13 }
  0x2b   :  { %p755_p5 = scmp.ne.s32.totalorder %s40_s13, %s754_s22  ;;  %p760_p7 = scmp.lt.s32.totalorder %s754_s22, %s754_s22 }
  0x2d   :  { %p761_p8 = por %p760_p7, %p759_p6 }
  0x2f   :  { %p762_p9 = pnand %p761_p8, %p755_p5 }
  0x31   :  { %765 = shalt.err (!%p762_p9)
}
  0x32   :  { %s809_s0 = smov 128   ;;  %s810_s18 = smov 8  }
  0x33   :  { %45 = dma.hbm_to_vmem [thread:$0]  %s907_s2, 3712, %s40_s13, [#allocation8], %s809_s0, %s809_s0, %s810_s18  }
  0x34   :  { %798 = dma.done.wait [#allocation4], 128  }
  0x35   :  { %799 = vsyncadd [#allocation4], 4294967168 }
  0x36   :  { %800 = dma.done.wait [#allocation8], 3840  }
  0x37   :  { %801 = vsyncadd [#allocation8], 4294963456  ;;  %vm56_vm0 = vcmask 261120   ;;  %v62_v0 = vld [vmem:[#allocation9] sm:$0xff]  ;;  %v63_v1 = vld [vmem:[#allocation9 + $0x8] sm:$0xff]  ;;  %vm265_vm1 = vcmask 523264  }
  0x38   :  { %v64_v2 = vld [vmem:[#allocation9 + $0x10] sm:$0xff]  ;;  %v624_v3 = vpack.c.bf16 %v63_v1, %v62_v0  ;;  %v65_v4 = vld [vmem:[#allocation9 + $0x18] sm:$0xff]  ;;  %v67_v8 = vld [vmem:[#allocation9 + $0x21] sm:$0xff]  ;;  %v811_v60 = vmov 0.0   ;;  %vm812_vm2 = vmmov 0   ;;  %s813_s2 = smov 112  }
  0x39   :  { %v55_v5 = vld [vmem:[#allocation3] sm:$0xff]  ;;  %v58_v6 = vld [vmem:[#allocation7] sm:$0xff]  ;;  %v628_v7 = vpack.c.bf16 %v65_v4, %v64_v2  ;;  %v71_v14 = vld [vmem:[#allocation9 + $0x41] sm:$0xff]  ;;  %vm350_vm3 = vcmask 130048   ;;  %vm433_vm4 = vcmask 7168   ;;  %vm426_vm5 = vcmask 64512  }
  0x3a   :  { %57 = vst.msk [vmem:[#allocation2] sm:$0xff] %vm56_vm0, %v55_v5  ;;  %59 = vst.msk [vmem:[#allocation2 + $0x8] sm:$0xff] %vm56_vm0, %v58_v6  ;;  %v68_v9 = vld [vmem:[#allocation9 + $0x29] sm:$0xff]  ;;  %v69_v10 = vld [vmem:[#allocation9 + $0x31] sm:$0xff]  ;;  %625 = vmatprep.subr.bf16.mxu0 %v624_v3  ;;  %s814_s25 = smov [#allocation10]  }
  0x3b   :  { %v632_v11 = vpack.c.bf16 %v68_v9, %v67_v8  ;;  %v70_v12 = vld [vmem:[#allocation9 + $0x39] sm:$0xff]  ;;  %627 = vmatpush3.bf16.msra.mxu0 %v624_v3  ;;  %v72_v15 = vld [vmem:[#allocation9 + $0x49] sm:$0xff]  ;;  %v73_v17 = vld [vmem:[#allocation9 + $0x51] sm:$0xff]  ;;  %s483_s26 = sshll.u32 %s814_s25, 4  ;;  %s484_s26 = int_to_ptr.vmem [resolvable:$true] %s483_s26 }
  0x3c   :  { %v636_v13 = vpack.c.bf16 %v70_v12, %v69_v10  ;;  %629 = vmatprep.subr.bf16.mxu0 %v628_v7  ;;  %v640_v16 = vpack.c.bf16 %v72_v15, %v71_v14  ;;  %v74_v18 = vld [vmem:[#allocation9 + $0x59] sm:$0xff]  ;;  %v75_v22 = vld [vmem:[#allocation9 + $0x61] sm:$0xff]  ;;  %v76_v23 = vld [vmem:[#allocation9 + $0x69] sm:$0xff]  ;;  %v449_v12 = vlaneseq  ;;  %s766_s27 = scalar_lea.vmem %s484_s26, 128  ;;  %p771_p11 = scmp.lt.s32.totalorder %s484_s26, %s484_s26 }
  0x3d   :  { %633 = vmatprep.subr.bf16.mxu1 %v632_v11  ;;  %v644_v21 = vpack.c.bf16 %v74_v18, %v73_v17  ;;  %v648_v24 = vpack.c.bf16 %v76_v23, %v75_v22  ;;  %v77_v25 = vld [vmem:[#allocation9 + $0x71] sm:$0xff]  ;;  %v78_v26 = vld [vmem:[#allocation9 + $0x79] sm:$0xff]  ;;  %v79_v28 = vld [vmem:[#allocation9 + $0x81] sm:$0xff]  ;;  %p767_p10 = scmp.ne.s32.totalorder %s484_s26, %s766_s27  ;;  %p772_p12 = scmp.lt.s32.totalorder %s766_s27, %s766_s27 }
  0x3e   :  { %635 = vmatpush3.bf16.msra.mxu1 %v632_v11  ;;  %v652_v27 = vpack.c.bf16 %v78_v26, %v77_v25  ;;  %v80_v29 = vld [vmem:[#allocation9 + $0x89] sm:$0xff]  ;;  %v81_v31 = vld [vmem:[#allocation9 + $0x91] sm:$0xff]  ;;  %v82_v32 = vld [vmem:[#allocation9 + $0x99] sm:$0xff]  ;;  %v452_v14 = vand.u32 127, %v449_v12 }
  0x3f   :  { %637 = vmatprep.subr.bf16.mxu1 %v636_v13  ;;  %631 = vmatpush3.bf16.msra.mxu0 %v628_v7  ;;  %v656_v30 = vpack.c.bf16 %v80_v29, %v79_v28  ;;  %v660_v33 = vpack.c.bf16 %v82_v32, %v81_v31  ;;  %v84_v34 = vld [vmem:[#allocation9 + $0xa2] sm:$0xff]  ;;  %v85_v35 = vld [vmem:[#allocation9 + $0xaa] sm:$0xff]  ;;  %v86_v36 = vld [vmem:[#allocation9 + $0xb2] sm:$0xff]  ;;  %p773_p13 = por %p772_p12, %p771_p11 }
  0x40   :  { %v664_v37 = vpack.c.bf16 %v85_v35, %v84_v34  ;;  %v87_v38 = vld [vmem:[#allocation9 + $0xba] sm:$0xff]  ;;  %v88_v40 = vld [vmem:[#allocation9 + $0xc2] sm:$0xff]  ;;  %v89_v41 = vld [vmem:[#allocation9 + $0xca] sm:$0xff] }
  0x41   :  { %v60_v19 = vld [vmem:[#allocation2] sm:$0xff]  ;;  %v61_v20 = vld [vmem:[#allocation2 + $0x8] sm:$0xff]  ;;  %v668_v39 = vpack.c.bf16 %v87_v38, %v86_v36  ;;  %v672_v42 = vpack.c.bf16 %v89_v41, %v88_v40  ;;  %v90_v50 = vld [vmem:[#allocation9 + $0xd2] sm:$0xff]  ;;  %p774_p0 = pnand %p773_p13, %p767_p10 }
  0x42   :  { %562 = vmatprep.mubr.msk.f32.mxu0 %vm56_vm0, %v60_v19  ;;  %639 = vmatpush3.bf16.msra.mxu1 %v636_v13  ;;  %v506_v43 = vld [vmem:[#allocation9 + $0x20] ss:$0 sm:$0xff]  ;;  %v509_v53 = vld [vmem:[#allocation9 + $0xa1] ss:$0 sm:$0xff]  ;;  %v510_v61 = vld [vmem:[#allocation9 + $0xe2] ss:$0 sm:$0xff] }
  0x43   :  { %563 = vmatmul.mubr.msk.f32.vlgmr.msra.gmra.mrb[0].mxu0 %vm56_vm0, %v61_v20  ;;  %641 = vmatprep.subr.bf16.mxu1 %v640_v16  ;;  %v91_v51 = vld [vmem:[#allocation9 + $0xda] sm:$0xff]  ;;  %v450_v13 = vshrl.u32 %v449_v12, 7 }
  0x44   :  { %665 = vmatprep.subr.bf16.mxu0 %v664_v37  ;;  %v676_v52 = vpack.c.bf16 %v91_v51, %v90_v50 }
  0x45   :  { %667 = vmatpush3.bf16.msra.mxu0 %v664_v37  ;;  %vm453_vm6 = vcmp.ne.s32.totalorder %v450_v13, %v452_v14 }
  0x46   :  { %643 = vmatpush3.bf16.msra.mxu1 %v640_v16  ;;  %669 = vmatprep.subr.bf16.mxu0 %v668_v39 }
  0x47   :  { %645 = vmatprep.subr.bf16.mxu1 %v644_v21 }
  0x49   :  { %671 = vmatpush3.bf16.msra.mxu0 %v668_v39 }
  0x4a   :  { %647 = vmatpush3.bf16.msra.mxu1 %v644_v21  ;;  %673 = vmatprep.subr.bf16.mxu0 %v672_v42 }
  0x4b   :  { %649 = vmatprep.subr.bf16.mxu1 %v648_v24 }
  0x4d   :  { %675 = vmatpush3.bf16.msra.mxu0 %v672_v42 }
  0x4e   :  { %651 = vmatpush3.bf16.msra.mxu1 %v648_v24  ;;  %677 = vmatprep.subr.bf16.mxu0 %v676_v52 }
  0x4f   :  { %653 = vmatprep.subr.bf16.mxu1 %v652_v27 }
  0x51   :  { %679 = vmatpush3.bf16.msra.mxu0 %v676_v52 }
  0x52   :  { %655 = vmatpush3.bf16.msra.mxu1 %v652_v27  ;;  %619 = vmatprep.subr.mxu0 %v811_v60 }
  0x53   :  { %657 = vmatprep.subr.bf16.mxu1 %v656_v30 }
  0x56   :  { %659 = vmatpush3.bf16.msra.mxu1 %v656_v30 }
  0x57   :  { %661 = vmatprep.subr.bf16.mxu1 %v660_v33 }
  0x5a   :  { %663 = vmatpush3.bf16.msra.mxu1 %v660_v33 }
 0x116   :  { %v564_v44 = vpop.f32.mrb[0].mxu0 }
 0x117   :  { %v175_v45 = vadd.f32 %v564_v44, %v506_v43  ;;  %v169_v46 = vpop.f32.mrb[1].mxu0 }
 0x118   :  { %v170_v47 = vadd.f32 %v506_v43, %v169_v46 }
 0x119   :  { %v179_v49 = vmax.f32 %v175_v45, 0.0 }
 0x11a   :  { %v178_v48 = vmax.f32 %v170_v47, 0.0 }
 0x11c   :  { %597 = vmatprep.mubr.f32.mxu1 %v178_v48 }
 0x11d   :  { %598 = vmatmul.mubr.f32.vlgmr.msra.gmra.mrb[0].mxu1 %v179_v49 }
 0x1f0   :  { %v599_v54 = vpop.f32.mrb[0].mxu1 }
 0x1f1   :  { %v256_v55 = vadd.f32 %v599_v54, %v509_v53  ;;  %v250_v56 = vpop.f32.mrb[1].mxu1 }
 0x1f2   :  { %v251_v57 = vadd.f32 %v509_v53, %v250_v56 }
 0x1f3   :  { %v260_v59 = vmax.f32 %v256_v55, 0.0 }
 0x1f4   :  { %v259_v58 = vmax.f32 %v251_v57, 0.0 }
 0x1f6   :  { %616 = vmatprep.mubr.msk.f32.mxu0 %vm265_vm1, %v259_v58 }
 0x1f7   :  { %617 = vmatmul.mubr.msk.f32.vlgmr.msra.gmra.mrb[2].mxu0 %vm265_vm1, %v260_v59 }
 0x1f8   :  { %621 = vmatprep.mubr.msk.f32.mxu0 %vm812_vm2, %v811_v60 }
 0x2ca   :  { %v618_v62 = vpop.f32.mrb[2].mxu0 }
 0x2cb   :  { %v344_v63 = vadd.f32 %v618_v62, %v510_v61  ;;  %v338_v0 = vpop.f32.mrb[3].mxu0 }
 0x2cc   :  { %v339_v1 = vadd.f32 %v510_v61, %v338_v0 }
 0x2cd   :  { %348 = vrot.lane.b32.xlu0 %v344_v63, %s813_s2 }
 0x33f   :  { %v349_v2 = vpop.permute.xlu0 %348 }
 0x340   :  { %v429_v3 = vmul.f32 %v349_v2, %v339_v1  ;;  %620 = vmatpush3.xpose.msk.msra.mxu0 %vm350_vm3, %v349_v2 }
 0x342   :  { %v430_v4 = vsel %vm350_vm3, %v429_v3, 0.0 }
 0x343   :  { %431 = vadd.xlane.f32.xlu0 %v430_v4  ;;  %622 = vmatmul.mubr.msk.f32.vlgmr.msra.gmra.mrb[4].mxu0 %vm350_vm3, %v339_v1 }
 0x3d0   :  { %v432_v5 = vpop.xlane.xlu0 %431 }
 0x3d1   :  { %v434_v6 = vsel %vm433_vm4, %v432_v5, 0.0 }
 0x3d2   :  { %435 = vadd.xlane.f32.xlu1 %v434_v6 }
 0x416   :  { %v422_v7 = vpop.f32.mrb[4].mxu0 }
 0x417   :  { %v515_v8 = vclamps-f32 %v422_v7, 5.0  ;;  %v623_v9 = vpop.f32.mrb[5].mxu0  ;;  %427 = vst.msk [vmem:[#allocation10] sm:$0xff] %vm426_vm5, %v422_v7 }
 0x419   :  { %v516_v10 = vadd.f32 -5.0, %v515_v8 }
 0x41b   :  { %v455_v11 = vmul.f32 1.442695, %v516_v10 }
 0x41d   :  { %696 = vpow2.f32 %v455_v11 }
 0x427   :  { %v697_v15 = vpop.eup %696 }
 0x428   :  { %v457_v16 = vsel %vm453_vm6, %v697_v15, 0.0 }
 0x429   :  { %v458_v17 = vsel %vm426_vm5, %v457_v16, 0.0 }
 0x42a   :  { %459 = vadd.xlane.f32.xlu1 %v458_v17 }
 0x45f   :  { %v436_v18 = vpop.xlane.xlu1 %435 }
 0x460   :  { %v437_v19 = vrot.slane %v436_v18, 4 }
 0x462   :  { %v438_v20 = vadd.f32 %v437_v19, %v436_v18 }
 0x464   :  { %v439_v21 = vrot.slane %v438_v20, 2 }
 0x466   :  { %v440_v22 = vadd.f32 %v439_v21, %v438_v20 }
 0x468   :  { %v441_v23 = vrot.slane %v440_v22, 1 }
 0x46a   :  { %v442_v24 = vadd.f32 %v441_v23, %v440_v22 }
 0x46c   :  { %680 = vpush %v442_v24 }
 0x4b7   :  { %v460_v25 = vpop.xlane.xlu1 %459 }
 0x4b8   :  { %v461_v26 = vrot.slane %v460_v25, 4 }
 0x4ba   :  { %v462_v27 = vadd.f32 %v461_v26, %v460_v25 }
 0x4bc   :  { %v463_v28 = vrot.slane %v462_v27, 2 }
 0x4bd   :  { %777 = shalt.err (!%p774_p0)
}
 0x4be   :  { %s778_s30 = scalar_lea.hbm %s908_s3, 128 }
 0x4bf   :  { %p779_p1 = scmp.ne.s32.totalorder %s908_s3, %s778_s30  ;;  %p782_p2 = scmp.lt.u32.totalorder %s778_s30, %s908_s3 }
 0x4c1   :  { %p784_p3 = pnand %p782_p2, %p779_p1 }
 0x4c3   :  { %787 = shalt.err (!%p784_p3)
}
 0x4c4   :  { %486 = dma.vmem_to_hbm [thread:$0]  %s484_s26, 128, %s908_s3, [#allocation5]   ;;  %v464_v29 = vadd.f32 %v463_v28, %v462_v27 }
 0x4c5   :  { %s681_s1 = spop %680  ;;  %s788_s3 = scalar_lea.hbm %s909_s4, 16 }
 0x4c6   :  { %v465_v30 = vrot.slane %v464_v29, 1  ;;  %s446_s14 = smul.f32 0.125, %s681_s1  ;;  %p789_p4 = scmp.ne.s32.totalorder %s909_s4, %s788_s3 }
 0x4c7   :  { %p792_p5 = scmp.lt.u32.totalorder %s788_s3, %s909_s4 }
 0x4c8   :  { %v466_v31 = vadd.f32 %v465_v30, %v464_v29 }
 0x4c9   :  { %p794_p6 = pnand %p792_p5, %p789_p4 }
 0x4ca   :  { %682 = vpush %v466_v31 }
 0x4fb   :  { %s683_s11 = spop %682 }
 0x4fc   :  { %v468_v32 = vstv %s683_s11 }
 0x4fd   :  { %698 = vlog2.f32 %v468_v32 }
 0x507   :  { %v699_v33 = vpop.eup %698 }
 0x508   :  { %v470_v34 = vmul.f32 0.6931472, %v699_v33 }
 0x50a   :  { %684 = vpush %v470_v34 }
 0x53b   :  { %s685_s12 = spop %684 }
 0x53c   :  { %s472_s13 = sadd.f32 5.0, %s685_s12 }
 0x53e   :  { %s517_s15 = sadd.f32 -4.0253515, %s472_s13 }
 0x540   :  { %s474_s16 = ssub.f32 %s446_s14, %s517_s15 }
 0x542   :  { %476 = sst [smem:[#allocation11]] %s474_s16 }
 0x543   :  { %797 = shalt.err (!%p794_p6)
}
 0x544   :  { %s815_s18 = smov [#allocation11]  }
 0x545   :  { %494 = dma.smem_to_hbm %s815_s18, 16, %s909_s4, [#allocation6]  }
 0x546   :  { %802 = dma.done.wait [#allocation5], 128  }
 0x547   :  { %803 = vsyncadd [#allocation5], 4294967168 }
 0x548   :  { %804 = dma.done.wait [#allocation6], 16  }
 0x549   :  { %805 = vsyncadd [#allocation6], 4294967280 }
 0x54a   :  { %501 = sfence }
 0x54b   :  { %502 = vsyncpa [#allocation4], 1 }
 0x54c   :  { %503 = vsyncpa [#allocation8], 1 }
 0x54d   :  { %504 = vsyncpa [#allocation5], 1 }
 0x54e   :  { %505 = vsyncpa [#allocation6], 1 }

</bundles_post_ra>
